<compile_context>
chip_gen: v7x
topology: tpu7x:2x2x1
jax: 0.10.0
libtpu: 0.0.40
codegen_flags: <defaults>
</compile_context>

<pallas_src>
import math

import jax
import jax.numpy as jnp
from jax import lax
from jax.experimental import pallas as pl
from jax.experimental.pallas import tpu as pltpu

_LN_EPS = 1e-5            # torch.nn.LayerNorm default
_NEG_INF = -1000000000.0  # matches torch.where(att_mask, 0.0, -1000000000.0)


def _layer_norm(x, gamma, beta):
    mu = jnp.mean(x, axis=-1, keepdims=True)
    var = jnp.mean(jnp.square(x - mu), axis=-1, keepdims=True)
    return (x - mu) * lax.rsqrt(var + _LN_EPS) * gamma + beta


def _make_sasrec_kernel(n_layers, n_heads):
    """Fused whole-encoder kernel; one grid step processes one (Bt, S, D) batch tile."""

    def kernel(x_ref, lm_ref, pos_ref,
               ln0_g_ref, ln0_b_ref,
               lna_g_ref, lna_b_ref, wqkv_ref, bqkv_ref, wo_ref, bo_ref,
               lnf_g_ref, lnf_b_ref, w1_ref, b1_ref, w2_ref, b2_ref,
               o_ref):
        Bt, S, D = x_ref.shape
        M = Bt * S
        dk = D // n_heads

        # --- additive causal + padding mask, built in-kernel from log_mask flags ---
        key_valid = lm_ref[...] != 0.0                                 # (Bt, 1, S)
        row = lax.broadcasted_iota(jnp.int32, (S, S), 0)
        col = lax.broadcasted_iota(jnp.int32, (S, S), 1)
        causal = (row >= col)[None]                                     # (1, S, S)
        mask_add = jnp.where(key_valid & causal, 0.0, _NEG_INF).astype(jnp.float32)

        def softmax(x):
            m = jnp.max(x, axis=-1, keepdims=True)
            e = jnp.exp(x - m)
            # divide via EUP reciprocal (separate issue slot) instead of VALU divide
            return e * pl.reciprocal(jnp.sum(e, axis=-1, keepdims=True), approx=True)

        # encoder input: LayerNorm(x + pos_emb); dropout == identity (eval)
        x = x_ref[...].astype(jnp.float32) + pos_ref[...][None].astype(jnp.float32)
        h = _layer_norm(x.reshape(M, D), ln0_g_ref[...], ln0_b_ref[...])

        def layer(l, h):
            # ---- multi-head self-attention sublayer (pre-LN residual) ----
            xn = _layer_norm(h, lna_g_ref[l], lna_b_ref[l]).astype(jnp.bfloat16)
            qkv = jnp.dot(xn, wqkv_ref[l],
                          preferred_element_type=jnp.float32) + bqkv_ref[l]  # (M, 3D)
            qkv = qkv.reshape(Bt, S, 3 * D)
            ctxs = []
            for hh in range(n_heads):
                lo = hh * dk
                qh = qkv[:, :, lo:lo + dk].astype(jnp.bfloat16)
                kh = qkv[:, :, D + lo:D + lo + dk].astype(jnp.bfloat16)
                vh = qkv[:, :, 2 * D + lo:2 * D + lo + dk].astype(jnp.bfloat16)
                s = jnp.einsum("bqd,bkd->bqk", qh, kh,
                               preferred_element_type=jnp.float32)  # 1/sqrt(dk) folded in Wq
                p = softmax(s + mask_add)
                ctxs.append(jnp.einsum("bqk,bkd->bqd", p.astype(jnp.bfloat16), vh,
                                       preferred_element_type=jnp.float32))
            # ONE full-depth (K = D) output projection instead of n_heads K=dk matmuls
            ctx = jnp.concatenate(ctxs, axis=-1).reshape(M, D).astype(jnp.bfloat16)
            h = h + jnp.dot(ctx, wo_ref[l],
                            preferred_element_type=jnp.float32) + bo_ref[l]

            # ---- position-wise feed-forward sublayer (pre-LN residual) ----
            xn = _layer_norm(h, lnf_g_ref[l], lnf_b_ref[l]).astype(jnp.bfloat16)
            f = jnp.dot(xn, w1_ref[l],
                        preferred_element_type=jnp.float32) + b1_ref[l]
            f = jax.nn.gelu(f, approximate=True).astype(jnp.bfloat16)  # BERT-pytorch tanh GELU
            return h + jnp.dot(f, w2_ref[l],
                               preferred_element_type=jnp.float32) + b2_ref[l]

        h = lax.fori_loop(0, n_layers, layer, h)
        o_ref[...] = h.reshape(Bt, S, D).astype(o_ref.dtype)

    return kernel


def sasrec_encoder_pallas(params, n_heads, input_embs, log_mask):
    B, S, D = input_embs.shape
    L = params["wqkv"].shape[0]
    dff = params["w1"].shape[-1]

    # batch tile: fold several rows into the matmul M dimension per grid step
    bt = min(B, 8)
    while B % bt:
        bt -= 1

    kernel = _make_sasrec_kernel(L, n_heads)

    c2 = lambda i: (0, 0)
    c3 = lambda i: (0, 0, 0)
    per_b3 = lambda i: (i, 0, 0)

    # scoped-VMEM budget: resident bf16 weights (x2 buffers) + f32 activations + I/O
    weight_bytes = 2 * 2 * L * (D * 3 * D + D * D + 2 * D * dff)
    act_bytes = 4 * bt * S * (8 * D + 3 * D + dff + n_heads * S)
    io_bytes = 2 * 2 * bt * S * D * 4
    vmem_limit = int(min(100 << 20,
                         max(32 << 20, 2 * (weight_bytes + act_bytes + io_bytes))))

    lm = (log_mask != 0).astype(jnp.float32)[:, None, :]          # (B, 1, S) key-valid flags

    return pl.pallas_call(
        kernel,
        out_shape=jax.ShapeDtypeStruct((B, S, D), input_embs.dtype),
        grid_spec=pltpu.PrefetchScalarGridSpec(
            num_scalar_prefetch=0,
            grid=(B // bt,),
            in_specs=[
                pl.BlockSpec((bt, S, D), per_b3),        # input_embs tile
                pl.BlockSpec((bt, 1, S), per_b3),        # key-valid flags (replaces B,S,S mask)
                pl.BlockSpec((S, D), c2),                # positional embedding rows [0, S)
                pl.BlockSpec((1, D), c2),                # encoder LN gamma
                pl.BlockSpec((1, D), c2),                # encoder LN beta
                pl.BlockSpec((L, 1, D), c3),             # attn-sublayer LN gamma (stacked)
                pl.BlockSpec((L, 1, D), c3),             # attn-sublayer LN beta
                pl.BlockSpec((L, D, 3 * D), c3),         # fused QKV weight (bf16, pre-transposed)
                pl.BlockSpec((L, 1, 3 * D), c3),         # fused QKV bias
                pl.BlockSpec((L, D, D), c3),             # attn output weight (bf16)
                pl.BlockSpec((L, 1, D), c3),             # attn output bias
                pl.BlockSpec((L, 1, D), c3),             # ffn-sublayer LN gamma
                pl.BlockSpec((L, 1, D), c3),             # ffn-sublayer LN beta
                pl.BlockSpec((L, D, dff), c3),           # FFN W1 (bf16)
                pl.BlockSpec((L, 1, dff), c3),           # FFN b1
                pl.BlockSpec((L, dff, D), c3),           # FFN W2 (bf16)
                pl.BlockSpec((L, 1, D), c3),             # FFN b2
            ],
            out_specs=pl.BlockSpec((bt, S, D), per_b3),
        ),
        compiler_params=pltpu.CompilerParams(
            dimension_semantics=("parallel",),
            vmem_limit_bytes=vmem_limit),
    )(input_embs, lm, params["pos_emb"][:S],
      params["ln0_g"], params["ln0_b"],
      params["lna_g"], params["lna_b"], params["wqkv"], params["bqkv"],
      params["wo"], params["bo"],
      params["lnf_g"], params["lnf_b"], params["w1"], params["b1"],
      params["w2"], params["b2"])


class UserEncoderSASRec:
    """JAX/Pallas equivalent of User_Encoder_SASRec (inference forward)."""

    def __init__(self, max_seq_len, embedding_dim, num_attention_heads, drop_rate,
                 transformer_block, key):
        D = embedding_dim
        L = transformer_block
        dff = 4 * D
        assert D % num_attention_heads == 0
        dk = D // num_attention_heads
        self.n_heads = num_attention_heads
        self.drop_rate = drop_rate  # identity at eval time

        def xavier_normal(k, out_dim, in_dim):   # torch Linear/Embedding weight (out, in)
            std = math.sqrt(2.0 / (in_dim + out_dim))
            return std * jax.random.normal(k, (out_dim, in_dim), jnp.float32)

        key, k_pos = jax.random.split(key)
        pos_emb = xavier_normal(k_pos, max_seq_len, D)   # nn.Embedding -> xavier_normal_

        wqkv, wo, w1, w2 = [], [], [], []
        for _ in range(L):
            key, kq, kk, kv, ko, k1, k2 = jax.random.split(key, 7)
            wq = xavier_normal(kq, D, D) / math.sqrt(dk)  # fold attention scale into Q
            wk = xavier_normal(kk, D, D)
            wv = xavier_normal(kv, D, D)
            # pre-transpose + fuse: x @ [Wq^T/sqrt(dk) | Wk^T | Wv^T]  -> (D, 3D)
            wqkv.append(jnp.concatenate([wq.T, wk.T, wv.T], axis=1))
            wo.append(xavier_normal(ko, D, D).T)
            w1.append(xavier_normal(k1, dff, D).T)        # (D, dff)
            w2.append(xavier_normal(k2, D, dff).T)        # (dff, D)

        bf16 = jnp.bfloat16
        self.params = dict(
            pos_emb=pos_emb,
            ln0_g=jnp.ones((1, D), jnp.float32), ln0_b=jnp.zeros((1, D), jnp.float32),
            lna_g=jnp.ones((L, 1, D), jnp.float32), lna_b=jnp.zeros((L, 1, D), jnp.float32),
            lnf_g=jnp.ones((L, 1, D), jnp.float32), lnf_b=jnp.zeros((L, 1, D), jnp.float32),
            wqkv=jnp.stack(wqkv).astype(bf16), bqkv=jnp.zeros((L, 1, 3 * D), jnp.float32),
            wo=jnp.stack(wo).astype(bf16), bo=jnp.zeros((L, 1, D), jnp.float32),
            w1=jnp.stack(w1).astype(bf16), b1=jnp.zeros((L, 1, dff), jnp.float32),
            w2=jnp.stack(w2).astype(bf16), b2=jnp.zeros((L, 1, D), jnp.float32),
        )

    def __call__(self, input_embs, log_mask, local_rank=None):
        # local_rank (torch device placement) has no JAX equivalent; ignored.
        return sasrec_encoder_pallas(self.params, self.n_heads, input_embs, log_mask)


def _sasrec_reference(params, n_heads, input_embs, log_mask):
    """Pure-JAX (XLA) reference using the same bf16-operand / f32-accumulate math."""
    B, S, D = input_embs.shape
    dk = D // n_heads
    bf16 = jnp.bfloat16

    key_valid = (log_mask != 0)[:, None, :]
    causal = jnp.tril(jnp.ones((S, S), bool))[None]
    mask_add = jnp.where(key_valid & causal, 0.0, _NEG_INF).astype(jnp.float32)

    def mm(a, w):
        return jnp.dot(a.astype(bf16), w.astype(bf16), preferred_element_type=jnp.float32)

    h = _layer_norm((input_embs + params["pos_emb"][:S][None]).astype(jnp.float32),
                    params["ln0_g"], params["ln0_b"])
    L = params["wqkv"].shape[0]
    for l in range(L):
        xn = _layer_norm(h, params["lna_g"][l], params["lna_b"][l])
        qkv = mm(xn, params["wqkv"][l]) + params["bqkv"][l]
        q, k, v = qkv[..., :D], qkv[..., D:2 * D], qkv[..., 2 * D:]
        q = q.reshape(B, S, n_heads, dk).transpose(0, 2, 1, 3)
        k = k.reshape(B, S, n_heads, dk).transpose(0, 2, 1, 3)
        v = v.reshape(B, S, n_heads, dk).transpose(0, 2, 1, 3)
        s = jnp.einsum("bhqd,bhkd->bhqk", q.astype(bf16), k.astype(bf16),
                       preferred_element_type=jnp.float32) + mask_add[:, None]
        m = jnp.max(s, axis=-1, keepdims=True)
        e = jnp.exp(s - m)
        p = e / jnp.sum(e, axis=-1, keepdims=True)
        ctx = jnp.einsum("bhqk,bhkd->bqhd", p.astype(bf16), v.astype(bf16),
                         preferred_element_type=jnp.float32).reshape(B, S, D)
        h = h + mm(ctx, params["wo"][l]) + params["bo"][l]
        xn = _layer_norm(h, params["lnf_g"][l], params["lnf_b"][l])
        f = jax.nn.gelu(mm(xn, params["w1"][l]) + params["b1"][l], approximate=True)
        h = h + mm(f, params["w2"][l]) + params["b2"][l]
    return h


if __name__ == "__main__":
    B, S, D = 2, 8, 32          # batch, max_seq_len, embedding_dim
    n_heads = 2                 # num_attention_heads
    n_blocks = 2                # transformer_block
    drop_rate = 0.1             # identity in eval mode

    key = jax.random.PRNGKey(0)
    key, k_inp, k_par = jax.random.split(key, 3)
    input_embs = jax.random.normal(k_inp, (B, S, D), jnp.float32)
    # log_mask: 0 = padding position (SASRec left-padding), nonzero = real item
    log_mask = jnp.array([[0, 0, 0, 1, 1, 1, 1, 1],
                          [1, 1, 1, 1, 1, 1, 1, 1]], jnp.float32)

    model = UserEncoderSASRec(max_seq_len=S, embedding_dim=D,
                              num_attention_heads=n_heads, drop_rate=drop_rate,
                              transformer_block=n_blocks, key=k_par)

    out = jax.block_until_ready(model(input_embs, log_mask, local_rank=None))
    assert out.shape == (B, S, D), out.shape

    ref = _sasrec_reference(model.params, n_heads, input_embs, log_mask)
    err = float(jnp.max(jnp.abs(out - ref)))
    # bf16 MXU operands + approx EUP reciprocal in softmax -> slightly looser tolerance
    assert jnp.allclose(out, ref, atol=5e-2, rtol=5e-2), err

    print("KERNEL_OK")
</pallas_src>

<mosaic_0001>
module attributes {stable_mosaic.version = 11 : i64} {
  func.func @kernel(%arg0: i32, %arg1: memref<2x8x32xf32, #tpu.memory_space<vmem>>, %arg2: memref<2x1x8xf32, #tpu.memory_space<vmem>>, %arg3: memref<8x32xf32, #tpu.memory_space<vmem>>, %arg4: memref<1x32xf32, #tpu.memory_space<vmem>>, %arg5: memref<1x32xf32, #tpu.memory_space<vmem>>, %arg6: memref<2x1x32xf32, #tpu.memory_space<vmem>>, %arg7: memref<2x1x32xf32, #tpu.memory_space<vmem>>, %arg8: memref<2x32x96xbf16, #tpu.memory_space<vmem>>, %arg9: memref<2x1x96xf32, #tpu.memory_space<vmem>>, %arg10: memref<2x32x32xbf16, #tpu.memory_space<vmem>>, %arg11: memref<2x1x32xf32, #tpu.memory_space<vmem>>, %arg12: memref<2x1x32xf32, #tpu.memory_space<vmem>>, %arg13: memref<2x1x32xf32, #tpu.memory_space<vmem>>, %arg14: memref<2x32x128xbf16, #tpu.memory_space<vmem>>, %arg15: memref<2x1x128xf32, #tpu.memory_space<vmem>>, %arg16: memref<2x128x32xbf16, #tpu.memory_space<vmem>>, %arg17: memref<2x1x32xf32, #tpu.memory_space<vmem>>, %arg18: memref<2x8x32xf32, #tpu.memory_space<vmem>>) attributes {dimension_semantics = [#tpu.dimension_semantics<parallel>], iteration_bounds = array<i64: 1>, scalar_prefetch = 0 : i64, scratch_operands = 0 : i64, tpu.core_type = #tpu.core_type<tc>, window_params = [{transform_indices = @transform_0, window_bounds = array<i64: 2, 8, 32>}, {transform_indices = @transform_1, window_bounds = array<i64: 2, 1, 8>}, {pipeline_mode = #tpu.pipeline_mode<synchronous>, transform_indices = @transform_2, window_bounds = array<i64: 8, 32>}, {pipeline_mode = #tpu.pipeline_mode<synchronous>, transform_indices = @transform_3, window_bounds = array<i64: 1, 32>}, {pipeline_mode = #tpu.pipeline_mode<synchronous>, transform_indices = @transform_4, window_bounds = array<i64: 1, 32>}, {pipeline_mode = #tpu.pipeline_mode<synchronous>, transform_indices = @transform_5, window_bounds = array<i64: 2, 1, 32>}, {pipeline_mode = #tpu.pipeline_mode<synchronous>, transform_indices = @transform_6, window_bounds = array<i64: 2, 1, 32>}, {pipeline_mode = #tpu.pipeline_mode<synchronous>, transform_indices = @transform_7, window_bounds = array<i64: 2, 32, 96>}, {pipeline_mode = #tpu.pipeline_mode<synchronous>, transform_indices = @transform_8, window_bounds = array<i64: 2, 1, 96>}, {pipeline_mode = #tpu.pipeline_mode<synchronous>, transform_indices = @transform_9, window_bounds = array<i64: 2, 32, 32>}, {pipeline_mode = #tpu.pipeline_mode<synchronous>, transform_indices = @transform_10, window_bounds = array<i64: 2, 1, 32>}, {pipeline_mode = #tpu.pipeline_mode<synchronous>, transform_indices = @transform_11, window_bounds = array<i64: 2, 1, 32>}, {pipeline_mode = #tpu.pipeline_mode<synchronous>, transform_indices = @transform_12, window_bounds = array<i64: 2, 1, 32>}, {pipeline_mode = #tpu.pipeline_mode<synchronous>, transform_indices = @transform_13, window_bounds = array<i64: 2, 32, 128>}, {pipeline_mode = #tpu.pipeline_mode<synchronous>, transform_indices = @transform_14, window_bounds = array<i64: 2, 1, 128>}, {pipeline_mode = #tpu.pipeline_mode<synchronous>, transform_indices = @transform_15, window_bounds = array<i64: 2, 128, 32>}, {pipeline_mode = #tpu.pipeline_mode<synchronous>, transform_indices = @transform_16, window_bounds = array<i64: 2, 1, 32>}, {transform_indices = @transform_17, window_bounds = array<i64: 2, 8, 32>}]} {
    %c0 = arith.constant 0 : index
    %c0_0 = arith.constant 0 : index
    %c0_1 = arith.constant 0 : index
    %0 = vector.load %arg2[%c0, %c0_0, %c0_1] : memref<2x1x8xf32, #tpu.memory_space<vmem>>, vector<2x1x8xf32>
    %cst = arith.constant 0.000000e+00 : f32
    %1 = vector.broadcast %cst : f32 to vector<2x1x8xf32>
    %2 = arith.cmpf one, %0, %1 : vector<2x1x8xf32>
    %3 = tpu.iota {dimensions = array<i32: 0>} : vector<8x8xi32>
    %4 = tpu.iota {dimensions = array<i32: 1>} : vector<8x8xi32>
    %5 = arith.cmpi sge, %3, %4 : vector<8x8xi32>
    %6 = vector.shape_cast %5 : vector<8x8xi1> to vector<1x8x8xi1>
    %7 = vector.broadcast %2 : vector<2x1x8xi1> to vector<2x8x8xi1>
    %8 = vector.broadcast %6 : vector<1x8x8xi1> to vector<2x8x8xi1>
    %9 = arith.andi %7, %8 : vector<2x8x8xi1>
    %cst_2 = arith.constant 0.000000e+00 : f32
    %cst_3 = arith.constant -1.000000e+09 : f32
    %10 = vector.broadcast %cst_2 : f32 to vector<2x8x8xf32>
    %11 = vector.broadcast %cst_3 : f32 to vector<2x8x8xf32>
    %12 = arith.select %9, %10, %11 : vector<2x8x8xi1>, vector<2x8x8xf32>
    %c0_4 = arith.constant 0 : index
    %c0_5 = arith.constant 0 : index
    %c0_6 = arith.constant 0 : index
    %13 = vector.load %arg1[%c0_4, %c0_5, %c0_6] : memref<2x8x32xf32, #tpu.memory_space<vmem>>, vector<2x8x32xf32>
    %c0_7 = arith.constant 0 : index
    %c0_8 = arith.constant 0 : index
    %14 = vector.load %arg3[%c0_7, %c0_8] : memref<8x32xf32, #tpu.memory_space<vmem>>, vector<8x32xf32>
    %15 = vector.shape_cast %14 : vector<8x32xf32> to vector<1x8x32xf32>
    %16 = vector.broadcast %15 : vector<1x8x32xf32> to vector<2x8x32xf32>
    %17 = arith.addf %13, %16 : vector<2x8x32xf32>
    %18 = vector.shape_cast %17 : vector<2x8x32xf32> to vector<16x32xf32>
    %c0_9 = arith.constant 0 : index
    %c0_10 = arith.constant 0 : index
    %19 = vector.load %arg4[%c0_9, %c0_10] : memref<1x32xf32, #tpu.memory_space<vmem>>, vector<1x32xf32>
    %c0_11 = arith.constant 0 : index
    %c0_12 = arith.constant 0 : index
    %20 = vector.load %arg5[%c0_11, %c0_12] : memref<1x32xf32, #tpu.memory_space<vmem>>, vector<1x32xf32>
    %cst_13 = arith.constant dense<0.000000e+00> : vector<16xf32>
    %21 = vector.multi_reduction <add>, %18, %cst_13 [1] : vector<16x32xf32> to vector<16xf32>
    %22 = vector.shape_cast %21 : vector<16xf32> to vector<16x1xf32>
    %cst_14 = arith.constant 3.200000e+01 : f32
    %23 = vector.broadcast %cst_14 : f32 to vector<16x1xf32>
    %24 = arith.divf %22, %23 : vector<16x1xf32>
    %25 = vector.broadcast %24 : vector<16x1xf32> to vector<16x32xf32>
    %26 = arith.subf %18, %25 : vector<16x32xf32>
    %27 = arith.mulf %26, %26 : vector<16x32xf32>
    %cst_15 = arith.constant dense<0.000000e+00> : vector<16xf32>
    %28 = vector.multi_reduction <add>, %27, %cst_15 [1] : vector<16x32xf32> to vector<16xf32>
    %29 = vector.shape_cast %28 : vector<16xf32> to vector<16x1xf32>
    %cst_16 = arith.constant 3.200000e+01 : f32
    %30 = vector.broadcast %cst_16 : f32 to vector<16x1xf32>
    %31 = arith.divf %29, %30 : vector<16x1xf32>
    %32 = vector.broadcast %24 : vector<16x1xf32> to vector<16x32xf32>
    %33 = arith.subf %18, %32 : vector<16x32xf32>
    %cst_17 = arith.constant 9.99999974E-6 : f32
    %34 = vector.broadcast %cst_17 : f32 to vector<16x1xf32>
    %35 = arith.addf %31, %34 : vector<16x1xf32>
    %36 = math.rsqrt %35 : vector<16x1xf32>
    %37 = vector.broadcast %36 : vector<16x1xf32> to vector<16x32xf32>
    %38 = arith.mulf %33, %37 : vector<16x32xf32>
    %39 = vector.broadcast %19 : vector<1x32xf32> to vector<16x32xf32>
    %40 = arith.mulf %38, %39 : vector<16x32xf32>
    %41 = vector.broadcast %20 : vector<1x32xf32> to vector<16x32xf32>
    %42 = arith.addf %40, %41 : vector<16x32xf32>
    %c0_i32 = arith.constant 0 : i32
    %c2_i32 = arith.constant 2 : i32
    %43 = arith.addi %c0_i32, %c2_i32 : i32
    %c1_i32 = arith.constant 1 : i32
    %44 = scf.for %arg19 = %c0_i32 to %43 step %c1_i32 iter_args(%arg20 = %42) -> (vector<16x32xf32>)  : i32 {
      %47 = arith.index_cast %arg19 : i32 to index
      %c0_22 = arith.constant 0 : index
      %c0_23 = arith.constant 0 : index
      %48 = vector.load %arg6[%47, %c0_22, %c0_23] : memref<2x1x32xf32, #tpu.memory_space<vmem>>, vector<1x1x32xf32>
      %49 = vector.shape_cast %48 : vector<1x1x32xf32> to vector<1x32xf32>
      %50 = arith.index_cast %arg19 : i32 to index
      %c0_24 = arith.constant 0 : index
      %c0_25 = arith.constant 0 : index
      %51 = vector.load %arg7[%50, %c0_24, %c0_25] : memref<2x1x32xf32, #tpu.memory_space<vmem>>, vector<1x1x32xf32>
      %52 = vector.shape_cast %51 : vector<1x1x32xf32> to vector<1x32xf32>
      %cst_26 = arith.constant dense<0.000000e+00> : vector<16xf32>
      %53 = vector.multi_reduction <add>, %arg20, %cst_26 [1] : vector<16x32xf32> to vector<16xf32>
      %54 = vector.shape_cast %53 : vector<16xf32> to vector<16x1xf32>
      %cst_27 = arith.constant 3.200000e+01 : f32
      %55 = vector.broadcast %cst_27 : f32 to vector<16x1xf32>
      %56 = arith.divf %54, %55 : vector<16x1xf32>
      %57 = vector.broadcast %56 : vector<16x1xf32> to vector<16x32xf32>
      %58 = arith.subf %arg20, %57 : vector<16x32xf32>
      %59 = arith.mulf %58, %58 : vector<16x32xf32>
      %cst_28 = arith.constant dense<0.000000e+00> : vector<16xf32>
      %60 = vector.multi_reduction <add>, %59, %cst_28 [1] : vector<16x32xf32> to vector<16xf32>
      %61 = vector.shape_cast %60 : vector<16xf32> to vector<16x1xf32>
      %cst_29 = arith.constant 3.200000e+01 : f32
      %62 = vector.broadcast %cst_29 : f32 to vector<16x1xf32>
      %63 = arith.divf %61, %62 : vector<16x1xf32>
      %64 = vector.broadcast %56 : vector<16x1xf32> to vector<16x32xf32>
      %65 = arith.subf %arg20, %64 : vector<16x32xf32>
      %cst_30 = arith.constant 9.99999974E-6 : f32
      %66 = vector.broadcast %cst_30 : f32 to vector<16x1xf32>
      %67 = arith.addf %63, %66 : vector<16x1xf32>
      %68 = math.rsqrt %67 : vector<16x1xf32>
      %69 = vector.broadcast %68 : vector<16x1xf32> to vector<16x32xf32>
      %70 = arith.mulf %65, %69 : vector<16x32xf32>
      %71 = vector.broadcast %49 : vector<1x32xf32> to vector<16x32xf32>
      %72 = arith.mulf %70, %71 : vector<16x32xf32>
      %73 = vector.broadcast %52 : vector<1x32xf32> to vector<16x32xf32>
      %74 = arith.addf %72, %73 : vector<16x32xf32>
      %75 = arith.truncf %74 : vector<16x32xf32> to vector<16x32xbf16>
      %76 = arith.index_cast %arg19 : i32 to index
      %c0_31 = arith.constant 0 : index
      %c0_32 = arith.constant 0 : index
      %77 = vector.load %arg8[%76, %c0_31, %c0_32] : memref<2x32x96xbf16, #tpu.memory_space<vmem>>, vector<1x32x96xbf16>
      %78 = vector.shape_cast %77 : vector<1x32x96xbf16> to vector<32x96xbf16>
      %cst_33 = arith.constant dense<0.000000e+00> : vector<16x96xf32>
      %79 = tpu.matmul %75, %78, %cst_33 {dimension_numbers = #tpu.dot_dimension_numbers<[1], [0], [0], [1], [0, 0, 1, 1], [], []>} : vector<16x32xbf16>, vector<32x96xbf16>, vector<16x96xf32> -> vector<16x96xf32>
      %80 = arith.index_cast %arg19 : i32 to index
      %c0_34 = arith.constant 0 : index
      %c0_35 = arith.constant 0 : index
      %81 = vector.load %arg9[%80, %c0_34, %c0_35] : memref<2x1x96xf32, #tpu.memory_space<vmem>>, vector<1x1x96xf32>
      %82 = vector.shape_cast %81 : vector<1x1x96xf32> to vector<1x96xf32>
      %83 = vector.broadcast %82 : vector<1x96xf32> to vector<16x96xf32>
      %84 = arith.addf %79, %83 : vector<16x96xf32>
      %85 = vector.shape_cast %84 : vector<16x96xf32> to vector<2x8x96xf32>
      %86 = vector.extract_strided_slice %85 {offsets = [0, 0, 0], sizes = [2, 8, 16], strides = [1, 1, 1]} : vector<2x8x96xf32> to vector<2x8x16xf32>
      %87 = arith.truncf %86 : vector<2x8x16xf32> to vector<2x8x16xbf16>
      %88 = vector.extract_strided_slice %85 {offsets = [0, 0, 32], sizes = [2, 8, 16], strides = [1, 1, 1]} : vector<2x8x96xf32> to vector<2x8x16xf32>
      %89 = arith.truncf %88 : vector<2x8x16xf32> to vector<2x8x16xbf16>
      %90 = vector.extract_strided_slice %85 {offsets = [0, 0, 64], sizes = [2, 8, 16], strides = [1, 1, 1]} : vector<2x8x96xf32> to vector<2x8x16xf32>
      %91 = arith.truncf %90 : vector<2x8x16xf32> to vector<2x8x16xbf16>
      "tpu.trace_start"() <{level = 10 : i32, message = "bqd,bkd->bqk"}> : () -> ()
      %cst_36 = arith.constant dense<0.000000e+00> : vector<2x8x8xf32>
      %92 = tpu.matmul %87, %89, %cst_36 {dimension_numbers = #tpu.dot_dimension_numbers<[2], [2], [1], [1], [0, 0, 0, 1, 1, 1], [0], [0]>} : vector<2x8x16xbf16>, vector<2x8x16xbf16>, vector<2x8x8xf32> -> vector<2x8x8xf32>
      "tpu.trace_stop"() : () -> ()
      %93 = arith.addf %92, %12 : vector<2x8x8xf32>
      %cst_37 = arith.constant dense<0xFF800000> : vector<2x8xf32>
      %94 = vector.multi_reduction <maximumf>, %93, %cst_37 [2] : vector<2x8x8xf32> to vector<2x8xf32>
      %95 = vector.shape_cast %94 : vector<2x8xf32> to vector<2x8x1xf32>
      %96 = vector.broadcast %95 : vector<2x8x1xf32> to vector<2x8x8xf32>
      %97 = arith.subf %93, %96 : vector<2x8x8xf32>
      %98 = math.exp %97 : vector<2x8x8xf32>
      %cst_38 = arith.constant dense<0.000000e+00> : vector<2x8xf32>
      %99 = vector.multi_reduction <add>, %98, %cst_38 [2] : vector<2x8x8xf32> to vector<2x8xf32>
      %100 = vector.shape_cast %99 : vector<2x8xf32> to vector<2x8x1xf32>
      %101 = tpu.reciprocal %100 {approx = true} : vector<2x8x1xf32> -> vector<2x8x1xf32>
      %102 = vector.broadcast %101 : vector<2x8x1xf32> to vector<2x8x8xf32>
      %103 = arith.mulf %98, %102 : vector<2x8x8xf32>
      %104 = arith.truncf %103 : vector<2x8x8xf32> to vector<2x8x8xbf16>
      "tpu.trace_start"() <{level = 10 : i32, message = "bqk,bkd->bqd"}> : () -> ()
      %cst_39 = arith.constant dense<0.000000e+00> : vector<2x8x16xf32>
      %105 = tpu.matmul %104, %91, %cst_39 {dimension_numbers = #tpu.dot_dimension_numbers<[2], [1], [1], [2], [0, 0, 0, 1, 1, 2], [0], [0]>} : vector<2x8x8xbf16>, vector<2x8x16xbf16>, vector<2x8x16xf32> -> vector<2x8x16xf32>
      "tpu.trace_stop"() : () -> ()
      %106 = vector.extract_strided_slice %85 {offsets = [0, 0, 16], sizes = [2, 8, 16], strides = [1, 1, 1]} : vector<2x8x96xf32> to vector<2x8x16xf32>
      %107 = arith.truncf %106 : vector<2x8x16xf32> to vector<2x8x16xbf16>
      %108 = vector.extract_strided_slice %85 {offsets = [0, 0, 48], sizes = [2, 8, 16], strides = [1, 1, 1]} : vector<2x8x96xf32> to vector<2x8x16xf32>
      %109 = arith.truncf %108 : vector<2x8x16xf32> to vector<2x8x16xbf16>
      %110 = vector.extract_strided_slice %85 {offsets = [0, 0, 80], sizes = [2, 8, 16], strides = [1, 1, 1]} : vector<2x8x96xf32> to vector<2x8x16xf32>
      %111 = arith.truncf %110 : vector<2x8x16xf32> to vector<2x8x16xbf16>
      "tpu.trace_start"() <{level = 10 : i32, message = "bqd,bkd->bqk"}> : () -> ()
      %cst_40 = arith.constant dense<0.000000e+00> : vector<2x8x8xf32>
      %112 = tpu.matmul %107, %109, %cst_40 {dimension_numbers = #tpu.dot_dimension_numbers<[2], [2], [1], [1], [0, 0, 0, 1, 1, 1], [0], [0]>} : vector<2x8x16xbf16>, vector<2x8x16xbf16>, vector<2x8x8xf32> -> vector<2x8x8xf32>
      "tpu.trace_stop"() : () -> ()
      %113 = arith.addf %112, %12 : vector<2x8x8xf32>
      %cst_41 = arith.constant dense<0xFF800000> : vector<2x8xf32>
      %114 = vector.multi_reduction <maximumf>, %113, %cst_41 [2] : vector<2x8x8xf32> to vector<2x8xf32>
      %115 = vector.shape_cast %114 : vector<2x8xf32> to vector<2x8x1xf32>
      %116 = vector.broadcast %115 : vector<2x8x1xf32> to vector<2x8x8xf32>
      %117 = arith.subf %113, %116 : vector<2x8x8xf32>
      %118 = math.exp %117 : vector<2x8x8xf32>
      %cst_42 = arith.constant dense<0.000000e+00> : vector<2x8xf32>
      %119 = vector.multi_reduction <add>, %118, %cst_42 [2] : vector<2x8x8xf32> to vector<2x8xf32>
      %120 = vector.shape_cast %119 : vector<2x8xf32> to vector<2x8x1xf32>
      %121 = tpu.reciprocal %120 {approx = true} : vector<2x8x1xf32> -> vector<2x8x1xf32>
      %122 = vector.broadcast %121 : vector<2x8x1xf32> to vector<2x8x8xf32>
      %123 = arith.mulf %118, %122 : vector<2x8x8xf32>
      %124 = arith.truncf %123 : vector<2x8x8xf32> to vector<2x8x8xbf16>
      "tpu.trace_start"() <{level = 10 : i32, message = "bqk,bkd->bqd"}> : () -> ()
      %cst_43 = arith.constant dense<0.000000e+00> : vector<2x8x16xf32>
      %125 = tpu.matmul %124, %111, %cst_43 {dimension_numbers = #tpu.dot_dimension_numbers<[2], [1], [1], [2], [0, 0, 0, 1, 1, 2], [0], [0]>} : vector<2x8x8xbf16>, vector<2x8x16xbf16>, vector<2x8x16xf32> -> vector<2x8x16xf32>
      "tpu.trace_stop"() : () -> ()
      %126 = tpu.concatenate %105, %125 in 2 : vector<2x8x16xf32>, vector<2x8x16xf32> -> vector<2x8x32xf32>
      %127 = vector.shape_cast %126 : vector<2x8x32xf32> to vector<16x32xf32>
      %128 = arith.truncf %127 : vector<16x32xf32> to vector<16x32xbf16>
      %129 = arith.index_cast %arg19 : i32 to index
      %c0_44 = arith.constant 0 : index
      %c0_45 = arith.constant 0 : index
      %130 = vector.load %arg10[%129, %c0_44, %c0_45] : memref<2x32x32xbf16, #tpu.memory_space<vmem>>, vector<1x32x32xbf16>
      %131 = vector.shape_cast %130 : vector<1x32x32xbf16> to vector<32x32xbf16>
      %cst_46 = arith.constant dense<0.000000e+00> : vector<16x32xf32>
      %132 = tpu.matmul %128, %131, %cst_46 {dimension_numbers = #tpu.dot_dimension_numbers<[1], [0], [0], [1], [0, 0, 1, 1], [], []>} : vector<16x32xbf16>, vector<32x32xbf16>, vector<16x32xf32> -> vector<16x32xf32>
      %133 = arith.addf %arg20, %132 : vector<16x32xf32>
      %134 = arith.index_cast %arg19 : i32 to index
      %c0_47 = arith.constant 0 : index
      %c0_48 = arith.constant 0 : index
      %135 = vector.load %arg11[%134, %c0_47, %c0_48] : memref<2x1x32xf32, #tpu.memory_space<vmem>>, vector<1x1x32xf32>
      %136 = vector.shape_cast %135 : vector<1x1x32xf32> to vector<1x32xf32>
      %137 = vector.broadcast %136 : vector<1x32xf32> to vector<16x32xf32>
      %138 = arith.addf %133, %137 : vector<16x32xf32>
      %139 = arith.index_cast %arg19 : i32 to index
      %c0_49 = arith.constant 0 : index
      %c0_50 = arith.constant 0 : index
      %140 = vector.load %arg12[%139, %c0_49, %c0_50] : memref<2x1x32xf32, #tpu.memory_space<vmem>>, vector<1x1x32xf32>
      %141 = vector.shape_cast %140 : vector<1x1x32xf32> to vector<1x32xf32>
      %142 = arith.index_cast %arg19 : i32 to index
      %c0_51 = arith.constant 0 : index
      %c0_52 = arith.constant 0 : index
      %143 = vector.load %arg13[%142, %c0_51, %c0_52] : memref<2x1x32xf32, #tpu.memory_space<vmem>>, vector<1x1x32xf32>
      %144 = vector.shape_cast %143 : vector<1x1x32xf32> to vector<1x32xf32>
      %cst_53 = arith.constant dense<0.000000e+00> : vector<16xf32>
      %145 = vector.multi_reduction <add>, %138, %cst_53 [1] : vector<16x32xf32> to vector<16xf32>
      %146 = vector.shape_cast %145 : vector<16xf32> to vector<16x1xf32>
      %cst_54 = arith.constant 3.200000e+01 : f32
      %147 = vector.broadcast %cst_54 : f32 to vector<16x1xf32>
      %148 = arith.divf %146, %147 : vector<16x1xf32>
      %149 = vector.broadcast %148 : vector<16x1xf32> to vector<16x32xf32>
      %150 = arith.subf %138, %149 : vector<16x32xf32>
      %151 = arith.mulf %150, %150 : vector<16x32xf32>
      %cst_55 = arith.constant dense<0.000000e+00> : vector<16xf32>
      %152 = vector.multi_reduction <add>, %151, %cst_55 [1] : vector<16x32xf32> to vector<16xf32>
      %153 = vector.shape_cast %152 : vector<16xf32> to vector<16x1xf32>
      %cst_56 = arith.constant 3.200000e+01 : f32
      %154 = vector.broadcast %cst_56 : f32 to vector<16x1xf32>
      %155 = arith.divf %153, %154 : vector<16x1xf32>
      %156 = vector.broadcast %148 : vector<16x1xf32> to vector<16x32xf32>
      %157 = arith.subf %138, %156 : vector<16x32xf32>
      %cst_57 = arith.constant 9.99999974E-6 : f32
      %158 = vector.broadcast %cst_57 : f32 to vector<16x1xf32>
      %159 = arith.addf %155, %158 : vector<16x1xf32>
      %160 = math.rsqrt %159 : vector<16x1xf32>
      %161 = vector.broadcast %160 : vector<16x1xf32> to vector<16x32xf32>
      %162 = arith.mulf %157, %161 : vector<16x32xf32>
      %163 = vector.broadcast %141 : vector<1x32xf32> to vector<16x32xf32>
      %164 = arith.mulf %162, %163 : vector<16x32xf32>
      %165 = vector.broadcast %144 : vector<1x32xf32> to vector<16x32xf32>
      %166 = arith.addf %164, %165 : vector<16x32xf32>
      %167 = arith.truncf %166 : vector<16x32xf32> to vector<16x32xbf16>
      %168 = arith.index_cast %arg19 : i32 to index
      %c0_58 = arith.constant 0 : index
      %c0_59 = arith.constant 0 : index
      %169 = vector.load %arg14[%168, %c0_58, %c0_59] : memref<2x32x128xbf16, #tpu.memory_space<vmem>>, vector<1x32x128xbf16>
      %170 = vector.shape_cast %169 : vector<1x32x128xbf16> to vector<32x128xbf16>
      %cst_60 = arith.constant dense<0.000000e+00> : vector<16x128xf32>
      %171 = tpu.matmul %167, %170, %cst_60 {dimension_numbers = #tpu.dot_dimension_numbers<[1], [0], [0], [1], [0, 0, 1, 1], [], []>} : vector<16x32xbf16>, vector<32x128xbf16>, vector<16x128xf32> -> vector<16x128xf32>
      %172 = arith.index_cast %arg19 : i32 to index
      %c0_61 = arith.constant 0 : index
      %c0_62 = arith.constant 0 : index
      %173 = vector.load %arg15[%172, %c0_61, %c0_62] : memref<2x1x128xf32, #tpu.memory_space<vmem>>, vector<1x1x128xf32>
      %174 = vector.shape_cast %173 : vector<1x1x128xf32> to vector<1x128xf32>
      %175 = vector.broadcast %174 : vector<1x128xf32> to vector<16x128xf32>
      %176 = arith.addf %171, %175 : vector<16x128xf32>
      %177 = arith.mulf %176, %176 : vector<16x128xf32>
      %178 = arith.mulf %176, %177 : vector<16x128xf32>
      %cst_63 = arith.constant 4.471500e-02 : f32
      %179 = vector.broadcast %cst_63 : f32 to vector<16x128xf32>
      %180 = arith.mulf %179, %178 : vector<16x128xf32>
      %181 = arith.addf %176, %180 : vector<16x128xf32>
      %cst_64 = arith.constant 0.797884583 : f32
      %182 = vector.broadcast %cst_64 : f32 to vector<16x128xf32>
      %183 = arith.mulf %182, %181 : vector<16x128xf32>
      %184 = math.tanh %183 : vector<16x128xf32>
      %cst_65 = arith.constant 1.000000e+00 : f32
      %185 = vector.broadcast %cst_65 : f32 to vector<16x128xf32>
      %186 = arith.addf %185, %184 : vector<16x128xf32>
      %cst_66 = arith.constant 5.000000e-01 : f32
      %187 = vector.broadcast %cst_66 : f32 to vector<16x128xf32>
      %188 = arith.mulf %187, %186 : vector<16x128xf32>
      %189 = arith.mulf %176, %188 : vector<16x128xf32>
      %190 = arith.truncf %189 : vector<16x128xf32> to vector<16x128xbf16>
      %191 = arith.index_cast %arg19 : i32 to index
      %c0_67 = arith.constant 0 : index
      %c0_68 = arith.constant 0 : index
      %192 = vector.load %arg16[%191, %c0_67, %c0_68] : memref<2x128x32xbf16, #tpu.memory_space<vmem>>, vector<1x128x32xbf16>
      %193 = vector.shape_cast %192 : vector<1x128x32xbf16> to vector<128x32xbf16>
      %cst_69 = arith.constant dense<0.000000e+00> : vector<16x32xf32>
      %194 = tpu.matmul %190, %193, %cst_69 {dimension_numbers = #tpu.dot_dimension_numbers<[1], [0], [0], [1], [0, 0, 1, 1], [], []>} : vector<16x128xbf16>, vector<128x32xbf16>, vector<16x32xf32> -> vector<16x32xf32>
      %195 = arith.addf %138, %194 : vector<16x32xf32>
      %196 = arith.index_cast %arg19 : i32 to index
      %c0_70 = arith.constant 0 : index
      %c0_71 = arith.constant 0 : index
      %197 = vector.load %arg17[%196, %c0_70, %c0_71] : memref<2x1x32xf32, #tpu.memory_space<vmem>>, vector<1x1x32xf32>
      %198 = vector.shape_cast %197 : vector<1x1x32xf32> to vector<1x32xf32>
      %199 = vector.broadcast %198 : vector<1x32xf32> to vector<16x32xf32>
      %200 = arith.addf %195, %199 : vector<16x32xf32>
      scf.yield %200 : vector<16x32xf32>
    }
    %c2_i32_18 = arith.constant 2 : i32
    %45 = vector.shape_cast %44 : vector<16x32xf32> to vector<2x8x32xf32>
    %c0_19 = arith.constant 0 : index
    %c0_20 = arith.constant 0 : index
    %c0_21 = arith.constant 0 : index
    %46 = vector.load %arg18[%c0_19, %c0_20, %c0_21] : memref<2x8x32xf32, #tpu.memory_space<vmem>>, vector<2x8x32xf32>
    tpu.vector_store %arg18[%c0_19, %c0_20, %c0_21], %45 {strides = array<i32>} : memref<2x8x32xf32, #tpu.memory_space<vmem>>, vector<2x8x32xf32>,
    return
  }
  func.func @transform_0(%arg0: i32) -> (i32, i32, i32) {
    %c0_i32 = arith.constant 0 : i32
    %c0_i32_0 = arith.constant 0 : i32
    %c0_i32_1 = arith.constant 0 : i32
    return %arg0, %c0_i32, %c0_i32_0 : i32, i32, i32
  }
  func.func @transform_1(%arg0: i32) -> (i32, i32, i32) {
    %c0_i32 = arith.constant 0 : i32
    %c0_i32_0 = arith.constant 0 : i32
    %c0_i32_1 = arith.constant 0 : i32
    return %arg0, %c0_i32, %c0_i32_0 : i32, i32, i32
  }
  func.func @transform_2(%arg0: i32) -> (i32, i32) {
    %c0_i32 = arith.constant 0 : i32
    %c0_i32_0 = arith.constant 0 : i32
    %c0_i32_1 = arith.constant 0 : i32
    return %c0_i32, %c0_i32_0 : i32, i32
  }
  func.func @transform_3(%arg0: i32) -> (i32, i32) {
    %c0_i32 = arith.constant 0 : i32
    %c0_i32_0 = arith.constant 0 : i32
    %c0_i32_1 = arith.constant 0 : i32
    return %c0_i32, %c0_i32_0 : i32, i32
  }
  func.func @transform_4(%arg0: i32) -> (i32, i32) {
    %c0_i32 = arith.constant 0 : i32
    %c0_i32_0 = arith.constant 0 : i32
    %c0_i32_1 = arith.constant 0 : i32
    return %c0_i32, %c0_i32_0 : i32, i32
  }
  func.func @transform_5(%arg0: i32) -> (i32, i32, i32) {
    %c0_i32 = arith.constant 0 : i32
    %c0_i32_0 = arith.constant 0 : i32
    %c0_i32_1 = arith.constant 0 : i32
    %c0_i32_2 = arith.constant 0 : i32
    return %c0_i32, %c0_i32_0, %c0_i32_1 : i32, i32, i32
  }
  func.func @transform_6(%arg0: i32) -> (i32, i32, i32) {
    %c0_i32 = arith.constant 0 : i32
    %c0_i32_0 = arith.constant 0 : i32
    %c0_i32_1 = arith.constant 0 : i32
    %c0_i32_2 = arith.constant 0 : i32
    return %c0_i32, %c0_i32_0, %c0_i32_1 : i32, i32, i32
  }
  func.func @transform_7(%arg0: i32) -> (i32, i32, i32) {
    %c0_i32 = arith.constant 0 : i32
    %c0_i32_0 = arith.constant 0 : i32
    %c0_i32_1 = arith.constant 0 : i32
    %c0_i32_2 = arith.constant 0 : i32
    return %c0_i32, %c0_i32_0, %c0_i32_1 : i32, i32, i32
  }
  func.func @transform_8(%arg0: i32) -> (i32, i32, i32) {
    %c0_i32 = arith.constant 0 : i32
    %c0_i32_0 = arith.constant 0 : i32
    %c0_i32_1 = arith.constant 0 : i32
    %c0_i32_2 = arith.constant 0 : i32
    return %c0_i32, %c0_i32_0, %c0_i32_1 : i32, i32, i32
  }
  func.func @transform_9(%arg0: i32) -> (i32, i32, i32) {
    %c0_i32 = arith.constant 0 : i32
    %c0_i32_0 = arith.constant 0 : i32
    %c0_i32_1 = arith.constant 0 : i32
    %c0_i32_2 = arith.constant 0 : i32
    return %c0_i32, %c0_i32_0, %c0_i32_1 : i32, i32, i32
  }
  func.func @transform_10(%arg0: i32) -> (i32, i32, i32) {
    %c0_i32 = arith.constant 0 : i32
    %c0_i32_0 = arith.constant 0 : i32
    %c0_i32_1 = arith.constant 0 : i32
    %c0_i32_2 = arith.constant 0 : i32
    return %c0_i32, %c0_i32_0, %c0_i32_1 : i32, i32, i32
  }
  func.func @transform_11(%arg0: i32) -> (i32, i32, i32) {
    %c0_i32 = arith.constant 0 : i32
    %c0_i32_0 = arith.constant 0 : i32
    %c0_i32_1 = arith.constant 0 : i32
    %c0_i32_2 = arith.constant 0 : i32
    return %c0_i32, %c0_i32_0, %c0_i32_1 : i32, i32, i32
  }
  func.func @transform_12(%arg0: i32) -> (i32, i32, i32) {
    %c0_i32 = arith.constant 0 : i32
    %c0_i32_0 = arith.constant 0 : i32
    %c0_i32_1 = arith.constant 0 : i32
    %c0_i32_2 = arith.constant 0 : i32
    return %c0_i32, %c0_i32_0, %c0_i32_1 : i32, i32, i32
  }
  func.func @transform_13(%arg0: i32) -> (i32, i32, i32) {
    %c0_i32 = arith.constant 0 : i32
    %c0_i32_0 = arith.constant 0 : i32
    %c0_i32_1 = arith.constant 0 : i32
    %c0_i32_2 = arith.constant 0 : i32
    return %c0_i32, %c0_i32_0, %c0_i32_1 : i32, i32, i32
  }
  func.func @transform_14(%arg0: i32) -> (i32, i32, i32) {
    %c0_i32 = arith.constant 0 : i32
    %c0_i32_0 = arith.constant 0 : i32
    %c0_i32_1 = arith.constant 0 : i32
    %c0_i32_2 = arith.constant 0 : i32
    return %c0_i32, %c0_i32_0, %c0_i32_1 : i32, i32, i32
  }
  func.func @transform_15(%arg0: i32) -> (i32, i32, i32) {
    %c0_i32 = arith.constant 0 : i32
    %c0_i32_0 = arith.constant 0 : i32
    %c0_i32_1 = arith.constant 0 : i32
    %c0_i32_2 = arith.constant 0 : i32
    return %c0_i32, %c0_i32_0, %c0_i32_1 : i32, i32, i32
  }
  func.func @transform_16(%arg0: i32) -> (i32, i32, i32) {
    %c0_i32 = arith.constant 0 : i32
    %c0_i32_0 = arith.constant 0 : i32
    %c0_i32_1 = arith.constant 0 : i32
    %c0_i32_2 = arith.constant 0 : i32
    return %c0_i32, %c0_i32_0, %c0_i32_1 : i32, i32, i32
  }
  func.func @transform_17(%arg0: i32) -> (i32, i32, i32) {
    %c0_i32 = arith.constant 0 : i32
    %c0_i32_0 = arith.constant 0 : i32
    %c0_i32_1 = arith.constant 0 : i32
    return %arg0, %c0_i32, %c0_i32_0 : i32, i32, i32
  }
}

</mosaic_0001>

<bundles_post_ra>
// kernel: tpu_custom_call.1
= control target key start
LH: loop header
LB: loop body
LE: loop exit
PB: predicated region body
PF: predicated region fallthrough
CT: control target
= control target key end

     0   :  { %s1755_s0 = inlined_call_operand.vmem [shape: f32[2,8,32], index: 0, kind: input, shape index: {}]   ;;  %s1756_s1 = inlined_call_operand.vmem [shape: f32[2,1,8], index: 1, kind: input, shape index: {}]   ;;  %s1757_s2 = inlined_call_operand.vmem [shape: f32[8,32], index: 2, kind: input, shape index: {}]   ;;  %s1758_s3 = inlined_call_operand.vmem [shape: f32[1,32], index: 3, kind: input, shape index: {}]   ;;  %s1759_s4 = inlined_call_operand.vmem [shape: f32[1,32], index: 4, kind: input, shape index: {}]   ;;  %s1760_s5 = inlined_call_operand.vmem [shape: f32[2,1,32], index: 5, kind: input, shape index: {}]   ;;  %s1761_s6 = inlined_call_operand.vmem [shape: f32[2,1,32], index: 6, kind: input, shape index: {}]   ;;  %s1762_s7 = inlined_call_operand.vmem [shape: bf16[2,32,96], index: 7, kind: input, shape index: {}]   ;;  %s1763_s8 = inlined_call_operand.vmem [shape: f32[2,1,96], index: 8, kind: input, shape index: {}]   ;;  %s1764_s9 = inlined_call_operand.vmem [shape: bf16[2,32,32], index: 9, kind: input, shape index: {}]   ;;  %s1765_s10 = inlined_call_operand.vmem [shape: f32[2,1,32], index: 10, kind: input, shape index: {}]   ;;  %s1766_s11 = inlined_call_operand.vmem [shape: f32[2,1,32], index: 11, kind: input, shape index: {}]   ;;  %s1767_s12 = inlined_call_operand.vmem [shape: f32[2,1,32], index: 12, kind: input, shape index: {}]   ;;  %s1768_s13 = inlined_call_operand.vmem [shape: bf16[2,32,128], index: 13, kind: input, shape index: {}]   ;;  %s1769_s14 = inlined_call_operand.vmem [shape: f32[2,1,128], index: 14, kind: input, shape index: {}]   ;;  %s1770_s15 = inlined_call_operand.vmem [shape: bf16[2,128,32], index: 15, kind: input, shape index: {}]   ;;  %s1771_s16 = inlined_call_operand.vmem [shape: f32[2,1,32], index: 16, kind: input, shape index: {}]   ;;  %s1772_s17 = inlined_call_operand.hbm [shape: f32[2,8,32], index: 17, kind: output, shape index: {}]  }
   0x1   :  { %1775 = sst [smem:[#allocation5_spill]] %s1755_s0 }
   0x2   :  { %1776 = sst [smem:[#allocation6_spill]] %s1756_s1 }
   0x3   :  { %s1777_s26 = sld [smem:[#allocation5_spill]]  ;;  %v87_v1 = vld [vmem:[%s1757_s2] sm:$0xff]  ;;  %vm92_vm0 = vcmask 261120  }
   0x9   :  { %v85_v0 = vld [vmem:[%s1777_s26] sm:$0xff]  ;;  %v86_v2 = vld [vmem:[%s1777_s26 + $0x8] sm:$0xff] }
   0xa   :  { %v88_v3 = vadd.f32 %v87_v1, %v85_v0  ;;  %v89_v4 = vadd.f32 %v87_v1, %v86_v2 }
   0xb   :  { %22 = vsyncpa [#allocation3], 0  ;;  %v62_v17 = vlaneseq  ;;  %s1778_s18 = sld [smem:[#allocation6_spill]]  ;;  %v1398_v22 = vmov 0   ;;  %v1399_v28 = vmov -1e+09  }
   0xc   :  { %v93_v5 = vsel %vm92_vm0, %v88_v3, 0.0  ;;  %v96_v6 = vsel %vm92_vm0, %v89_v4, 0.0  ;;  %v1091_v38 = vld [vmem:[%s1758_s3] ss:$0 sm:$0xff]  ;;  %s1534_s24 = smov 0  }
   0xd   :  { %94 = vadd.xlane.f32.xlu0 %v93_v5  ;;  %v63_v18 = vshrl.u32 %v62_v17, 7  ;;  %v65_v25 = vand.u32 127, %v62_v17  ;;  %v1092_v40 = vld [vmem:[%s1759_s4] ss:$0 sm:$0xff] }
   0xf   :  { %v71_v21 = vsub.s32 0, %v63_v18  ;;  %vm66_vm3 = vcmp.ge.s32.totalorder %v63_v18, %v65_v25 }
  0x11   :  { %97 = vadd.xlane.f32.xlu0 %v96_v6  ;;  %v58_v19 = vld [vmem:[%s1778_s18] sm:$0x1]  ;;  %v59_v20 = vld [vmem:[%s1778_s18 + $0x1] sm:$0x1] }
  0x12   :  { %vm60_vm1 = vcmp.ne.f32.partialorder %v58_v19, 0.0  ;;  %vm61_vm2 = vcmp.ne.f32.partialorder %v59_v20, 0.0 }
  0x13   :  { %v67_v23 = vsel %vm60_vm1, 1, %v1398_v22  ;;  %v68_v24 = vsel %vm61_vm2, 1, %v1398_v22 }
  0x14   :  { %v72_v26 = vrot.slane %v67_v23, %v71_v21  ;;  %v76_v27 = vrot.slane %v68_v24, %v71_v21 }
  0x16   :  { %vm77_vm4 = vcmp.eq.s32.totalorder %v72_v26, 1  ;;  %vm78_vm5 = vcmp.eq.s32.totalorder %v76_v27, 1 }
  0x17   :  { %vm81_vm6 = vmand %vm77_vm4, %vm66_vm3 }
  0x18   :  { %vm82_vm7 = vmand %vm78_vm5, %vm66_vm3  ;;  %v1520_v29 = vsel %vm81_vm6, 0.0, %v1399_v28 }
  0x19   :  { %v1522_v30 = vsel %vm82_vm7, 0.0, %v1399_v28 }
  0x9a   :  { %v95_v7 = vpop.xlane.xlu0 %94 }
  0x9b   :  { %v100_v8 = vmul.f32 0.03125, %v95_v7 }
  0x9d   :  { %v102_v9 = vsub.f32 %v88_v3, %v100_v8 }
  0x9e   :  { %v98_v10 = vpop.xlane.xlu0 %97 }
  0x9f   :  { %v101_v11 = vmul.f32 0.03125, %v98_v10  ;;  %v104_v12 = vmul.f32 %v102_v9, %v102_v9 }
  0xa1   :  { %v103_v13 = vsub.f32 %v89_v4, %v101_v11  ;;  %v106_v14 = vsel %vm92_vm0, %v104_v12, 0.0 }
  0xa2   :  { %107 = vadd.xlane.f32.xlu1 %v106_v14 }
  0xa3   :  { %v105_v15 = vmul.f32 %v103_v13, %v103_v13 }
  0xa5   :  { %v109_v16 = vsel %vm92_vm0, %v105_v15, 0.0 }
  0xa6   :  { %110 = vadd.xlane.f32.xlu1 %v109_v16 }
 0x12f   :  { %v108_v31 = vpop.xlane.xlu1 %107 }
 0x130   :  { %v112_v32 = vmul.f32 0.03125, %v108_v31 }
 0x132   :  { %v114_v33 = vadd.f32 1e-05, %v112_v32 }
 0x133   :  { %v111_v34 = vpop.xlane.xlu1 %110 }
 0x134   :  { %1299 = vrsqrt.f32 %v114_v33  ;;  %v113_v35 = vmul.f32 0.03125, %v111_v34 }
 0x136   :  { %v115_v36 = vadd.f32 1e-05, %v113_v35 }
 0x138   :  { %1301 = vrsqrt.f32 %v115_v36 }
 0x13e   :  { %v1300_v37 = vpop.eup %1299 }
 0x13f   :  { %v118_v39 = vmul.f32 %v1300_v37, %v102_v9 }
 0x141   :  { %v126_v41 = vmul.f32 %v1091_v38, %v118_v39 }
 0x142   :  { %v1302_v42 = vpop.eup %1301 }
 0x143   :  { %v134_v43 = vadd.f32 %v1092_v40, %v126_v41   ;;  %v119_v44 = vmul.f32 %v1302_v42, %v103_v13 }
 0x145   :  { %v127_v45 = vmul.f32 %v1091_v38, %v119_v44 }
 0x147   :  { %v135_v46 = vadd.f32 %v1092_v40, %v127_v45  }
 0x148 LB: > { %v148_v47 = vsel %vm92_vm0, %v1392_v43, 0.0  ;;  %v151_v48 = vsel %vm92_vm0, %v1388_v46, 0.0  ;;  %v1400_v59 = vmov 0.0   ;;  %vm1401_vm8 = vmmov 0   ;;  %s1132_s3 = sshll.u32 %s1396_s24, 4  ;;  %s1135_s0 = sshll.u32 %s1396_s24, 6  ;;  %s1396_s24 = sphi %s1534_s24, %s141_s24   ;;  %v1392_v43 = vphi %v134_v43, %v1780_v43   ;;  %v1388_v46 = vphi %v135_v46, %v1779_v46  }
 0x149   : > { %149 = vadd.xlane.f32.xlu0 %v148_v47  ;;  %1170 = vmatprep.subr.bf16.mxu0 %v1400_v59  ;;  %s193_s26 = scalar_lea.vmem %s1762_s7, %s1132_s3  ;;  %s1566_s29 = scalar_lea.vmem %s1764_s9, %s1132_s3  ;;  %vm267_vm9 = vcmask 130048   ;;  %vm363_vm10 = vcmask 64512   ;;  %vm393_vm11 = vcmask 1043456  }
 0x14a   : > { %1174 = vmatprep.mubr.msk.bf16.mxu0 %vm1401_vm8, %v1400_v59  ;;  %1190 = vmatprep.subr.bf16.mxu1 %v1400_v59  ;;  %v1308_v60 = vld [vmem:[%s193_s26] sm:$0xff]   ;;  %v1309_v61 = vld [vmem:[%s193_s26 + $0x8] sm:$0xff]   ;;  %s1572_s18 = scalar_lea.vmem %s1768_s13, %s1132_s3  ;;  %s1578_s20 = scalar_lea.vmem %s1770_s15, %s1135_s0 }
 0x14b   : > { %1192 = vmatprep.mubr.msk.bf16.mxu1 %vm1401_vm8, %v1400_v59  ;;  %1171 = vmatpush3.bf16.msra.mxu0 %v1308_v60  ;;  %s144_s23 = scalar_lea.vmem %s1760_s5, %s1396_s24  ;;  %s146_s25 = scalar_lea.vmem %s1761_s6, %s1396_s24 }
 0x14c   : > { %1172 = vmatprep.subr.bf16.mxu0 %v1400_v59  ;;  %v1093_v6 = vld [vmem:[%s144_s23] ss:$0 sm:$0xff]  ;;  %s198_s28 = scalar_lea.vmem %s1763_s8, %s1396_s24  ;;  %s1402_s0 = smov 96  }
 0x14d   : > { %152 = vadd.xlane.f32.xlu0 %v151_v48  ;;  %v1094_v10 = vld [vmem:[%s146_s25] ss:$0 sm:$0xff]  ;;  %s1403_s2 = smov 64   ;;  %s1404_s30 = smov 80  }
 0x14e   : > { %v1097_v15 = vld [vmem:[%s198_s28] ss:$0 sm:$0xff]  ;;  %s1405_s19 = smov 112   ;;  %s1406_s1 = smov 48  }
 0x14f   : > { %1173 = vmatpush3.bf16.msra.mxu0 %v1309_v61  ;;  %s1407_s21 = smov 16   ;;  %s780_s23 = scalar_lea.vmem %s1765_s10, %s1396_s24 }
 0x150   : > { %1178 = vmatprep.subr.bf16.mxu0 %v1400_v59  ;;  %s790_s25 = scalar_lea.vmem %s1766_s11, %s1396_s24  ;;  %s792_s27 = scalar_lea.vmem %s1767_s12, %s1396_s24 }
 0x1d6   : > { %v150_v49 = vpop.xlane.xlu0 %149 }
 0x1d7   : > { %v154_v50 = vmul.f32 0.03125, %v150_v49 }
 0x1d9   : > { %v156_v51 = vsub.f32 %v1392_v43, %v154_v50 }
 0x1da   : > { %v153_v52 = vpop.xlane.xlu0 %152 }
 0x1db   : > { %v155_v53 = vmul.f32 0.03125, %v153_v52  ;;  %v158_v54 = vmul.f32 %v156_v51, %v156_v51 }
 0x1dd   : > { %v157_v55 = vsub.f32 %v1388_v46, %v155_v53  ;;  %v160_v56 = vsel %vm92_vm0, %v158_v54, 0.0 }
 0x1de   : > { %161 = vadd.xlane.f32.xlu1 %v160_v56 }
 0x1df   : > { %v159_v57 = vmul.f32 %v157_v55, %v157_v55 }
 0x1e1   : > { %v163_v58 = vsel %vm92_vm0, %v159_v57, 0.0 }
 0x1e2   : > { %164 = vadd.xlane.f32.xlu1 %v163_v58 }
 0x26b   : > { %v162_v62 = vpop.xlane.xlu1 %161 }
 0x26c   : > { %v166_v63 = vmul.f32 0.03125, %v162_v62 }
 0x26e   : > { %v168_v0 = vadd.f32 1e-05, %v166_v63 }
 0x26f   : > { %v165_v1 = vpop.xlane.xlu1 %164 }
 0x270   : > { %1322 = vrsqrt.f32 %v168_v0  ;;  %v167_v2 = vmul.f32 0.03125, %v165_v1 }
 0x272   : > { %v169_v3 = vadd.f32 1e-05, %v167_v2 }
 0x274   : > { %1324 = vrsqrt.f32 %v169_v3 }
 0x27a   : > { %v1323_v4 = vpop.eup %1322 }
 0x27b   : > { %v172_v5 = vmul.f32 %v1323_v4, %v156_v51 }
 0x27d   : > { %v180_v9 = vmul.f32 %v1093_v6, %v172_v5 }
 0x27e   : > { %v1325_v7 = vpop.eup %1324 }
 0x27f   : > { %v173_v8 = vmul.f32 %v1325_v7, %v157_v55  ;;  %v188_v12 = vadd.f32 %v1094_v10, %v180_v9 }
 0x281   : > { %v181_v11 = vmul.f32 %v1093_v6, %v173_v8 }
 0x283   : > { %v189_v13 = vadd.f32 %v1094_v10, %v181_v11 }
 0x285   : > { %v190_v14 = vpack.c.bf16 %v189_v13, %v188_v12 }
 0x287   : > { %1175 = vmatmul.mubr.msk.bf16.vlgmr.msra.gmra.mrb[0].mxu0 %vm92_vm0, %v190_v14 }
 0x288   : > { %1180 = vmatprep.mubr.msk.bf16.mxu0 %vm1401_vm8, %v1400_v59 }
 0x35a   : > { %v255_v16 = vpop.f32.mrb[0].mxu0 }
 0x35b   : > { %v256_v17 = vadd.f32 %v1097_v15, %v255_v16  ;;  %v1176_v18 = vpop.f32.mrb[1].mxu0 }
 0x35c   : > { %v258_v19 = vpop.f32.mrb[2].mxu0 }
 0x35d   : > { %v1596_v20 = vpack.c.bf16 %v256_v17, %v256_v17  ;;  %v259_v21 = vadd.f32 %v1097_v15, %v258_v19  ;;  %v1177_v22 = vpop.f32.mrb[3].mxu0 }
 0x35f   : > { %v1598_v23 = vpack.c.bf16 %v259_v21, %v259_v21  ;;  %265 = vrot.lane.b32.xlu0 %v1596_v20, %s1402_s0 }
 0x361   : > { %315 = vrot.lane.b32.xlu1 %v1598_v23, %s1402_s0 }
 0x3d1   : > { %v266_v24 = vpop.permute.xlu0 %265 }
 0x3d2   : > { %v272_v25 = vsel %vm267_vm9, %v266_v24, 0 }
 0x3d3   : > { %1179 = vmatpush3.bf16.xpose.msra.mxu0 %v272_v25  ;;  %v316_v26 = vpop.permute.xlu1 %315 }
 0x3d4   : > { %1184 = vmatprep.subr.bf16.mxu0 %v1400_v59  ;;  %v321_v27 = vsel %vm267_vm9, %v316_v26, 0 }
 0x3da   : > { %1181 = vmatmul.mubr.msk.bf16.vlgmr.msra.gmra.mrb[4].mxu0 %vm267_vm9, %v1596_v20 }
 0x3db   : > { %1185 = vmatpush3.bf16.xpose.msra.mxu0 %v321_v27  ;;  %1186 = vmatprep.mubr.msk.bf16.mxu0 %vm1401_vm8, %v1400_v59 }
 0x3dc   : > { %1196 = vmatprep.subr.bf16.mxu0 %v1400_v59 }
 0x3e2   : > { %1187 = vmatmul.mubr.msk.bf16.vlgmr.msra.gmra.mrb[8].mxu0 %vm267_vm9, %v1598_v23 }
 0x3e3   : > { %1198 = vmatprep.mubr.msk.bf16.mxu0 %vm1401_vm8, %v1400_v59 }
 0x4ad   : > { %v308_v28 = vpop.f32.mrb[4].mxu0 }
 0x4ae   : > { %v309_v31 = vadd.f32 %v308_v28, %v1520_v29  ;;  %v1182_v32 = vpop.f32.mrb[5].mxu0 }
 0x4af   : > { %v311_v33 = vpop.f32.mrb[6].mxu0 }
 0x4b0   : > { %v1183_v34 = vpop.f32.mrb[7].mxu0  ;;  %v364_v35 = vsel %vm363_vm10, %v309_v31, -inf }
 0x4b1   : > { %365 = vmax.xlane.f32.xlu1 %v364_v35 }
 0x4b5   : > { %v357_v36 = vpop.f32.mrb[8].mxu0 }
 0x4b6   : > { %v358_v37 = vadd.f32 %v357_v36, %v1522_v30  ;;  %v1188_v38 = vpop.f32.mrb[9].mxu0 }
 0x4b7   : > { %v360_v39 = vpop.f32.mrb[10].mxu0 }
 0x4b8   : > { %v1189_v40 = vpop.f32.mrb[11].mxu0  ;;  %v367_v41 = vsel %vm363_vm10, %v358_v37, -inf }
 0x4b9   : > { %368 = vmax.xlane.f32.xlu0 %v367_v41 }
 0x4c2   : > { %437 = vrot.lane.b32.xlu1 %v1598_v23, %s1403_s2 }
 0x4c6   : > { %487 = vrot.lane.b32.xlu1 %v1596_v20, %s1404_s30 }
 0x53e   : > { %v366_v42 = vpop.xlane.xlu1 %365 }
 0x53f   : > { %v370_v44 = vsub.f32 %v309_v31, %v366_v42 }
 0x541   : > { %v372_v45 = vmul.f32 1.442695, %v370_v44 }
 0x542   : > { %v438_v47 = vpop.permute.xlu1 %437 }
 0x543   : > { %1326 = vpow2.f32 %v372_v45  ;;  %v443_v48 = vsel %vm393_vm11, %v438_v47, 0 }
 0x544   : > { %1197 = vmatpush3.bf16.msra.mxu0 %v443_v48 }
 0x545   : > { %1208 = vmatprep.subr.bf16.mxu0 %v1400_v59 }
 0x546   : > { %v369_v49 = vpop.xlane.xlu0 %368  ;;  %v488_v57 = vpop.permute.xlu1 %487 }
 0x547   : > { %v371_v50 = vsub.f32 %v358_v37, %v369_v49  ;;  %v493_v1 = vsel %vm267_vm9, %v488_v57, 0 }
 0x549   : > { %v374_v51 = vmul.f32 1.442695, %v371_v50 }
 0x54b   : > { %1328 = vpow2.f32 %v374_v51 }
 0x54d   : > { %v1327_v52 = vpop.eup %1326 }
 0x54e   : > { %v376_v53 = vsel %vm363_vm10, %v1327_v52, 0.0 }
 0x54f   : > { %377 = vadd.xlane.f32.xlu0 %v376_v53 }
 0x555   : > { %v1329_v54 = vpop.eup %1328 }
 0x556   : > { %v379_v55 = vsel %vm363_vm10, %v1329_v54, 0.0 }
 0x557   : > { %380 = vadd.xlane.f32.xlu1 %v379_v55  ;;  %v1310_v55 = vld [vmem:[%s1566_s29] sm:$0xff]  }
 0x565   : > { %388 = vrot.lane.b32.xlu0 %v1596_v20, %s1403_s2  ;;  %s843_s2 = scalar_lea.vmem %s1769_s14, %s1396_s24 }
 0x568   : > { %537 = vrot.lane.b32.xlu1 %v1598_v23, %s1404_s30 }
 0x569   : > { %485 = vrot.lane.b32.xlu0 %v1596_v20, %s1405_s19 }
 0x56c   : > { %535 = vrot.lane.b32.xlu1 %v1598_v23, %s1405_s19  ;;  %s1036_s19 = scalar_lea.vmem %s1771_s16, %s1396_s24  ;;  %s141_s24 = sadd.s32 1, %s1396_s24  }
 0x56d   : > { %p138_p0 = scmp.ge.s32.totalorder %s141_s24, 2  }
 0x5dc   : > { %v378_v56 = vpop.xlane.xlu0 %377 }
 0x5dd   : > { %1330 = vrcp.f32 %v378_v56  ;;  %v1311_v56 = vld [vmem:[%s1566_s29 + $0x8] sm:$0xff]  }
 0x5e0   : > { %v389_v58 = vpop.permute.xlu0 %388 }
 0x5e1   : > { %v395_v60 = vsel %vm393_vm11, %v389_v58, 0 }
 0x5e2   : > { %1191 = vmatpush3.bf16.msra.mxu1 %v395_v60 }
 0x5e3   : > { %1202 = vmatprep.subr.bf16.mxu1 %v1400_v59 }
 0x5e4   : > { %v381_v61 = vpop.xlane.xlu1 %380  ;;  %v486_v6 = vpop.permute.xlu0 %485 }
 0x5e5   : > { %1332 = vrcp.f32 %v381_v61 }
 0x5e7   : > { %v1331_v62 = vpop.eup %1330 }
 0x5e8   : > { %v384_v63 = vmul.f32 %v1331_v62, %v1327_v52  ;;  %v538_v4 = vpop.permute.xlu1 %537 }
 0x5e9   : > { %v543_v7 = vsel %vm267_vm9, %v538_v4, 0 }
 0x5ea   : > { %v386_v0 = vpack.c.bf16 %v384_v63, %v384_v63 }
 0x5ec   : > { %1193 = vmatmul.mubr.msk.bf16.vlgmr.msra.gmra.mrb[0].mxu1 %vm363_vm10, %v386_v0  ;;  %v536_v8 = vpop.permute.xlu1 %535 }
 0x5ed   : > { %1203 = vmatpush3.bf16.xpose.msra.mxu1 %v493_v1  ;;  %1204 = vmatprep.mubr.msk.bf16.mxu1 %vm1401_vm8, %v1400_v59 }
 0x5ee   : > { %1214 = vmatprep.subr.bf16.mxu1 %v1400_v59 }
 0x5ef   : > { %v1333_v2 = vpop.eup %1332 }
 0x5f0   : > { %v385_v3 = vmul.f32 %v1333_v2, %v1329_v54 }
 0x5f2   : > { %v387_v5 = vpack.c.bf16 %v385_v3, %v385_v3 }
 0x5f4   : > { %1199 = vmatmul.mubr.msk.bf16.vlgmr.msra.gmra.mrb[12].mxu0 %vm363_vm10, %v387_v5  ;;  %1205 = vmatmul.mubr.msk.bf16.vlgmr.msra.gmra.mrb[4].mxu1 %vm267_vm9, %v486_v6 }
 0x5f5   : > { %1209 = vmatpush3.bf16.xpose.msra.mxu0 %v543_v7  ;;  %1210 = vmatprep.mubr.msk.bf16.mxu0 %vm1401_vm8, %v1400_v59 }
 0x5f6   : > { %1220 = vmatprep.subr.bf16.mxu0 %v1400_v59  ;;  %1216 = vmatprep.mubr.msk.bf16.mxu1 %vm1401_vm8, %v1400_v59 }
 0x5fc   : > { %1211 = vmatmul.mubr.msk.bf16.vlgmr.msra.gmra.mrb[16].mxu0 %vm267_vm9, %v536_v8 }
 0x5fd   : > { %1222 = vmatprep.mubr.msk.bf16.mxu0 %vm1401_vm8, %v1400_v59 }
 0x6bf   : > { %v1646_v9 = vpop.f32.mrb[0].mxu1 }
 0x6c0   : > { %v1194_v10 = vpop.f32.mrb[1].mxu1 }
 0x6c1   : > { %v434_v11 = vpop.f32.mrb[2].mxu1 }
 0x6c2   : > { %v1195_v12 = vpop.f32.mrb[3].mxu1  ;;  %v1113_v11 = vld [vmem:[%s780_s23] ss:$0 sm:$0xff] }
 0x6c7   : > { %v1648_v13 = vpop.f32.mrb[12].mxu0  ;;  %v529_v14 = vpop.f32.mrb[4].mxu1 }
 0x6c8   : > { %v530_v15 = vadd.f32 %v529_v14, %v1520_v29  ;;  %v1200_v16 = vpop.f32.mrb[13].mxu0  ;;  %v1206_v17 = vpop.f32.mrb[5].mxu1 }
 0x6c9   : > { %v482_v18 = vpop.f32.mrb[14].mxu0  ;;  %v532_v19 = vpop.f32.mrb[6].mxu1 }
 0x6ca   : > { %v1201_v21 = vpop.f32.mrb[15].mxu0  ;;  %v1207_v22 = vpop.f32.mrb[7].mxu1  ;;  %v585_v24 = vsel %vm363_vm10, %v530_v15, -inf }
 0x6cb   : > { %586 = vmax.xlane.f32.xlu0 %v585_v24 }
 0x6cf   : > { %v579_v25 = vpop.f32.mrb[16].mxu0 }
 0x6d0   : > { %v580_v26 = vadd.f32 %v579_v25, %v1522_v30  ;;  %v1212_v27 = vpop.f32.mrb[17].mxu0 }
 0x6d1   : > { %v582_v28 = vpop.f32.mrb[18].mxu0 }
 0x6d2   : > { %v1213_v31 = vpop.f32.mrb[19].mxu0  ;;  %v588_v32 = vsel %vm363_vm10, %v580_v26, -inf }
 0x6d3   : > { %589 = vmax.xlane.f32.xlu1 %v588_v32  ;;  %v1312_v32 = vld [vmem:[%s1572_s18] sm:$0xff]  }
 0x6e4   : > { %657 = vrot.lane.b32.xlu1 %v1598_v23, %s1406_s1 }
 0x758   : > { %v587_v33 = vpop.xlane.xlu0 %586 }
 0x759   : > { %v591_v34 = vsub.f32 %v530_v15, %v587_v33  ;;  %v1313_v33 = vld [vmem:[%s1572_s18 + $0x8] sm:$0xff]  }
 0x75b   : > { %v593_v35 = vmul.f32 1.442695, %v591_v34 }
 0x75d   : > { %1334 = vpow2.f32 %v593_v35 }
 0x760   : > { %v590_v36 = vpop.xlane.xlu1 %589 }
 0x761   : > { %v592_v37 = vsub.f32 %v580_v26, %v590_v36 }
 0x763   : > { %v595_v38 = vmul.f32 1.442695, %v592_v37 }
 0x764   : > { %v658_v39 = vpop.permute.xlu1 %657 }
 0x765   : > { %1336 = vpow2.f32 %v595_v38  ;;  %v663_v40 = vsel %vm393_vm11, %v658_v39, 0 }
 0x766   : > { %1221 = vmatpush3.bf16.msra.mxu0 %v663_v40 }
 0x767   : > { %v1335_v41 = vpop.eup %1334  ;;  %1234 = vmatprep.subr.bf16.mxu0 %v1400_v59 }
 0x768   : > { %v597_v42 = vsel %vm363_vm10, %v1335_v41, 0.0 }
 0x769   : > { %598 = vadd.xlane.f32.xlu0 %v597_v42  ;;  %v1114_v42 = vld [vmem:[%s790_s25] ss:$0 sm:$0xff] }
 0x76f   : > { %v1337_v44 = vpop.eup %1336 }
 0x770   : > { %v600_v23 = vsel %vm363_vm10, %v1337_v44, 0.0 }
 0x771   : > { %601 = vadd.xlane.f32.xlu0 %v600_v23 }
 0x787   : > { %609 = vrot.lane.b32.xlu0 %v1596_v20, %s1406_s1  ;;  %s1408_s1 = smov (%p138_p0), [#allocation2]  }
 0x7f6   : > { %v599_v45 = vpop.xlane.xlu0 %598 }
 0x7f7   : > { %1338 = vrcp.f32 %v599_v45 }
 0x7fe   : > { %v602_v47 = vpop.xlane.xlu0 %601 }
 0x7ff   : > { %1340 = vrcp.f32 %v602_v47  ;;  %v1115_v47 = vld [vmem:[%s792_s27] ss:$0 sm:$0xff] }
 0x801   : > { %v1339_v48 = vpop.eup %1338 }
 0x802   : > { %v605_v49 = vmul.f32 %v1339_v48, %v1335_v41  ;;  %v610_v50 = vpop.permute.xlu0 %609 }
 0x803   : > { %v615_v51 = vsel %vm393_vm11, %v610_v50, 0 }
 0x804   : > { %1215 = vmatpush3.bf16.msra.mxu1 %v615_v51  ;;  %v607_v52 = vpack.c.bf16 %v605_v49, %v605_v49 }
 0x805   : > { %1226 = vmatprep.subr.bf16.mxu1 %v1400_v59 }
 0x807   : > { %1217 = vmatmul.mubr.msk.bf16.vlgmr.msra.gmra.mrb[8].mxu1 %vm363_vm10, %v607_v52  ;;  %v1314_v52 = vld [vmem:[%s1578_s20] sm:$0xff]  }
 0x808   : > { %1230 = vmatprep.mubr.msk.bf16.mxu1 %vm1401_vm8, %v1400_v59  ;;  %1227 = vmatpush3.bf16.msra.mxu1 %v1310_v55  ;;  %v1318_v55 = vld [vmem:[%s1578_s20 + $0x20] sm:$0xff]  }
 0x809   : > { %v1341_v20 = vpop.eup %1340  ;;  %1228 = vmatprep.subr.bf16.mxu1 %v1400_v59 }
 0x80a   : > { %v606_v53 = vmul.f32 %v1341_v20, %v1337_v44  ;;  %v1315_v20 = vld [vmem:[%s1578_s20 + $0x8] sm:$0xff]  }
 0x80c   : > { %v608_v54 = vpack.c.bf16 %v606_v53, %v606_v53  ;;  %1229 = vmatpush3.bf16.msra.mxu1 %v1311_v56  ;;  %v1316_v53 = vld [vmem:[%s1578_s20 + $0x10] sm:$0xff]   ;;  %v1319_v56 = vld [vmem:[%s1578_s20 + $0x28] sm:$0xff]  }
 0x80d   : > { %1242 = vmatprep.subr.bf16.mxu1 %v1400_v59 }
 0x80e   : > { %1223 = vmatmul.mubr.msk.bf16.vlgmr.msra.gmra.mrb[20].mxu0 %vm363_vm10, %v608_v54  ;;  %v1317_v54 = vld [vmem:[%s1578_s20 + $0x18] sm:$0xff]  }
 0x80f   : > { %1238 = vmatprep.mubr.msk.bf16.mxu0 %vm1401_vm8, %v1400_v59  ;;  %1235 = vmatpush3.bf16.msra.mxu0 %v1312_v32 }
 0x810   : > { %1236 = vmatprep.subr.bf16.mxu0 %v1400_v59 }
 0x813   : > { %1237 = vmatpush3.bf16.msra.mxu0 %v1313_v33 }
 0x8da   : > { %v651_v57 = vpop.f32.mrb[8].mxu1 }
 0x8db   : > { %v1218_v58 = vpop.f32.mrb[9].mxu1 }
 0x8dc   : > { %v654_v60 = vpop.f32.mrb[10].mxu1  ;;  %v1321_v58 = vld [vmem:[%s1578_s20 + $0x38] sm:$0xff]  }
 0x8dd   : > { %v1219_v61 = vpop.f32.mrb[11].mxu1  ;;  %v1117_v60 = vld [vmem:[%s843_s2] ss:$0 sm:$0xff] }
 0x8e1   : > { %v699_v62 = vpop.f32.mrb[20].mxu0 }
 0x8e2   : > { %v1303_v63 = vpack.i.bf16 %v699_v62, %v651_v57  ;;  %v1224_v0 = vpop.f32.mrb[21].mxu0  ;;  %v1320_v57 = vld [vmem:[%s1578_s20 + $0x30] sm:$0xff]  }
 0x8e3   : > { %v702_v1 = vpop.f32.mrb[22].mxu0 }
 0x8e4   : > { %1304 = vrot.lane.b32.xlu1 %v1303_v63, %s1407_s21  ;;  %v1225_v2 = vpop.f32.mrb[23].mxu0  ;;  %s1053_s21 = sshll.u32 (%p138_p0), %s1408_s1, 4  ;;  %s1054_s21 = int_to_ptr.vmem [resolvable:$true] %s1053_s21 }
 0x8e5   :  { %s1350_s29 = scalar_lea.vmem (%p138_p0), %s1054_s21, 256  ;;  %p1355_p2 = scmp.lt.s32.totalorder (%p138_p0), %s1054_s21, %s1054_s21 }
 0x8e6   :  { %p1351_p1 = scmp.ne.s32.totalorder (%p138_p0), %s1054_s21, %s1350_s29  ;;  %p1356_p3 = scmp.lt.s32.totalorder (%p138_p0), %s1350_s29, %s1350_s29 }
 0x8e8   :  { %p1357_p4 = por (%p138_p0), %p1356_p3, %p1355_p2 }
 0x8ea   :  { %p1358_p5 = pnand (%p138_p0), %p1357_p4, %p1351_p1 }
 0x956   : > { %v1305_v3 = vpop.permute.xlu1 %1304 }
 0x957   : > { %v1307_v4 = vunpack.i.h.bf16 %v1305_v3  ;;  %v1306_v5 = vunpack.i.l.bf16 %v1305_v3 }
 0x959   : > { %v714_v6 = vsel %vm267_vm9, %v1648_v13, %v1307_v4  ;;  %v713_v7 = vsel %vm267_vm9, %v1646_v9, %v1306_v5 }
 0x95a   : > { %v715_v8 = vpack.c.bf16 %v714_v6, %v713_v7 }
 0x95c   : > { %1231 = vmatmul.mubr.msk.bf16.vlgmr.msra.gmra.mrb[12].mxu1 %vm92_vm0, %v715_v8 }
 0x95d   : > { %1258 = vmatprep.mubr.msk.bf16.mxu1 %vm1401_vm8, %v1400_v59  ;;  %1243 = vmatpush3.bf16.msra.mxu1 %v1314_v52 }
 0x95e   : > { %1244 = vmatprep.subr.bf16.mxu1 %v1400_v59 }
 0x961   : > { %1245 = vmatpush3.bf16.msra.mxu1 %v1315_v20 }
 0x962   : > { %1246 = vmatprep.subr.bf16.mxu1 %v1400_v59 }
 0x965   : > { %1247 = vmatpush3.bf16.msra.mxu1 %v1316_v53 }
 0x966   : > { %1248 = vmatprep.subr.bf16.mxu1 %v1400_v59 }
 0x969   : > { %1249 = vmatpush3.bf16.msra.mxu1 %v1317_v54 }
 0x96a   : > { %1250 = vmatprep.subr.bf16.mxu1 %v1400_v59 }
 0x96d   : > { %1251 = vmatpush3.bf16.msra.mxu1 %v1318_v55 }
 0x96e   : > { %1252 = vmatprep.subr.bf16.mxu1 %v1400_v59 }
 0x971   : > { %1253 = vmatpush3.bf16.msra.mxu1 %v1319_v56 }
 0x972   : > { %1254 = vmatprep.subr.bf16.mxu1 %v1400_v59 }
 0x975   : > { %1255 = vmatpush3.bf16.msra.mxu1 %v1320_v57 }
 0x976   : > { %1256 = vmatprep.subr.bf16.mxu1 %v1400_v59 }
 0x979   : > { %1257 = vmatpush3.bf16.msra.mxu1 %v1321_v58 }
 0xa2f   : > { %v771_v10 = vpop.f32.mrb[12].mxu1 }
 0xa30   : > { %v778_v12 = vadd.f32 %v1392_v43, %v771_v10  ;;  %v1232_v14 = vpop.f32.mrb[13].mxu1 }
 0xa31   : > { %v774_v15 = vpop.f32.mrb[14].mxu1 }
 0xa32   : > { %v1684_v13 = vadd.f32 %v1113_v11, %v778_v12  ;;  %v779_v9 = vadd.f32 %v1388_v46, %v774_v15  ;;  %v1233_v16 = vpop.f32.mrb[15].mxu1 }
 0xa34   : > { %v1687_v17 = vadd.f32 %v1113_v11, %v779_v9  ;;  %v794_v18 = vsel %vm92_vm0, %v1684_v13, 0.0 }
 0xa35   : > { %795 = vadd.xlane.f32.xlu1 %v794_v18 }
 0xa36   : > { %v797_v19 = vsel %vm92_vm0, %v1687_v17, 0.0 }
 0xa37   : > { %798 = vadd.xlane.f32.xlu0 %v797_v19 }
 0xac2   : > { %v796_v43 = vpop.xlane.xlu1 %795 }
 0xac3   : > { %v800_v21 = vmul.f32 0.03125, %v796_v43 }
 0xac4   : > { %v799_v22 = vpop.xlane.xlu0 %798 }
 0xac5   : > { %v802_v24 = vsub.f32 %v1684_v13, %v800_v21  ;;  %v801_v25 = vmul.f32 0.03125, %v799_v22 }
 0xac7   : > { %v803_v46 = vsub.f32 %v1687_v17, %v801_v25  ;;  %v804_v26 = vmul.f32 %v802_v24, %v802_v24  ;;  %v1131_v25 = vld [vmem:[%s1036_s19] ss:$0 sm:$0xff] }
 0xac9   : > { %v806_v27 = vsel %vm92_vm0, %v804_v26, 0.0  ;;  %v805_v28 = vmul.f32 %v803_v46, %v803_v46 }
 0xaca   : > { %807 = vadd.xlane.f32.xlu0 %v806_v27 }
 0xacb   : > { %v809_v31 = vsel %vm92_vm0, %v805_v28, 0.0 }
 0xace   : > { %810 = vadd.xlane.f32.xlu0 %v809_v31 }
 0xb57   : > { %v808_v34 = vpop.xlane.xlu0 %807 }
 0xb58   : > { %v812_v35 = vmul.f32 0.03125, %v808_v34 }
 0xb5a   : > { %v814_v36 = vadd.f32 1e-05, %v812_v35 }
 0xb5b   : > { %v811_v37 = vpop.xlane.xlu0 %810 }
 0xb5c   : > { %1342 = vrsqrt.f32 %v814_v36  ;;  %v813_v38 = vmul.f32 0.03125, %v811_v37 }
 0xb5e   : > { %v815_v39 = vadd.f32 1e-05, %v813_v38 }
 0xb60   : > { %1344 = vrsqrt.f32 %v815_v39 }
 0xb66   : > { %v1343_v40 = vpop.eup %1342 }
 0xb67   : > { %v818_v41 = vmul.f32 %v1343_v40, %v802_v24 }
 0xb69   : > { %v826_v45 = vmul.f32 %v1114_v42, %v818_v41 }
 0xb6a   : > { %v1345_v44 = vpop.eup %1344 }
 0xb6b   : > { %v819_v23 = vmul.f32 %v1345_v44, %v803_v46  ;;  %v834_v49 = vadd.f32 %v1115_v47, %v826_v45 }
 0xb6d   : > { %v827_v48 = vmul.f32 %v1114_v42, %v819_v23 }
 0xb6f   : > { %v835_v50 = vadd.f32 %v1115_v47, %v827_v48 }
 0xb71   : > { %v836_v51 = vpack.c.bf16 %v835_v50, %v834_v49 }
 0xb73   : > { %1239 = vmatmul.mubr.msk.bf16.vlgmr.msra.gmra.mrb[24].mxu0 %vm92_vm0, %v836_v51 }
 0xc46   : > { %v900_v61 = vpop.f32.mrb[24].mxu0 }
 0xc47   : > { %v901_v62 = vadd.f32 %v1117_v60, %v900_v61  ;;  %v1240_v63 = vpop.f32.mrb[25].mxu0 }
 0xc48   : > { %v903_v0 = vpop.f32.mrb[26].mxu0 }
 0xc49   : > { %v907_v1 = vmul.f32 %v901_v62, %v901_v62  ;;  %v904_v2 = vadd.f32 %v1117_v60, %v903_v0  ;;  %v1241_v3 = vpop.f32.mrb[27].mxu0 }
 0xc4b   : > { %v909_v4 = vmul.f32 %v907_v1, %v901_v62  ;;  %v908_v5 = vmul.f32 %v904_v2, %v904_v2 }
 0xc4d   : > { %v911_v6 = vmul.f32 0.044715, %v909_v4  ;;  %v910_v7 = vmul.f32 %v908_v5, %v904_v2 }
 0xc4f   : > { %v913_v8 = vadd.f32 %v911_v6, %v901_v62  ;;  %v912_v59 = vmul.f32 0.044715, %v910_v7 }
 0xc51   : > { %v915_v10 = vmul.f32 0.7978846, %v913_v8  ;;  %v914_v11 = vadd.f32 %v912_v59, %v904_v2 }
 0xc53   : > { %1346 = vtanh.f32 %v915_v10  ;;  %v916_v12 = vmul.f32 0.7978846, %v914_v11 }
 0xc55   : > { %1348 = vtanh.f32 %v916_v12 }
 0xc5d   : > { %v1347_v14 = vpop.eup %1346 }
 0xc5e   : > { %v919_v15 = vadd.f32 1.0, %v1347_v14 }
 0xc5f   : > { %v1349_v9 = vpop.eup %1348 }
 0xc60   : > { %v921_v16 = vmul.f32 0.5, %v919_v15  ;;  %v920_v18 = vadd.f32 1.0, %v1349_v9 }
 0xc62   : > { %v922_v19 = vmul.f32 0.5, %v920_v18  ;;  %v923_v43 = vmul.f32 %v921_v16, %v901_v62 }
 0xc64   : > { %v924_v21 = vmul.f32 %v922_v19, %v904_v2 }
 0xc66   : > { %v925_v22 = vpack.c.bf16 %v924_v21, %v923_v43 }
 0xc68   : > { %1259 = vmatmul.mubr.bf16.vlgmr.msra.gmra.mrb[16].mxu1 %v925_v22 }
 0xd3b   : > { %v1027_v24 = vpop.f32.mrb[16].mxu1 }
 0xd3c   : > { %v1034_v46 = vadd.f32 %v1027_v24, %v1684_v13  ;;  %v1260_v26 = vpop.f32.mrb[17].mxu1  ;;  %140 = sbr.rel (!%p138_p0) target bundleno = 328 (0x148), region = 107 }
 0xd3d   : > { %v1030_v27 = vpop.f32.mrb[18].mxu1 }
 0xd3e   : > { %v1044_v28 = vadd.f32 %v1131_v25, %v1034_v46   ;;  %v1035_v31 = vadd.f32 %v1030_v27, %v1687_v17  ;;  %v1261_v32 = vpop.f32.mrb[19].mxu1 }
 0xd40   : > { %v1045_v33 = vadd.f32 %v1131_v25, %v1035_v31   ;;  %v1780_v43 = vmov %v1044_v28  ;;  %1046 = vst.msk [vmem:[#allocation2] sm:$0xff] (%p138_p0), %vm92_vm0, %v1044_v28 }
 0xd42   : > { %v1779_v46 = vmov %v1045_v33  ;;  %1047 = vst.msk [vmem:[#allocation2 + $0x8] sm:$0xff] (%p138_p0), %vm92_vm0, %v1045_v33 }
 0xd43   :  { %1361 = shalt.err (!%p1358_p5)
}
 0xd44   :  { %s1362_s3 = scalar_lea.hbm %s1772_s17, 256 }
 0xd45   :  { %p1363_p6 = scmp.ne.s32.totalorder %s1772_s17, %s1362_s3  ;;  %p1366_p7 = scmp.lt.u32.totalorder %s1362_s3, %s1772_s17 }
 0xd47   :  { %p1368_p8 = pnand %p1366_p7, %p1363_p6 }
 0xd49   :  { %1371 = shalt.err (!%p1368_p8)
}
 0xd4a   :  { %s1409_s7 = smov 128   ;;  %s1410_s8 = smov 8  }
 0xd4b   :  { %1059 = dma.vmem_to_hbm [thread:$0]  %s1054_s21, 256, %s1772_s17, [#allocation3], %s1409_s7, %s1409_s7, %s1410_s8  }
 0xd4c   :  { %1384 = dma.done.wait [#allocation3], 256  }
 0xd4d   :  { %1385 = vsyncadd [#allocation3], 4294967040 }
 0xd4e   :  { %1063 = vsyncpa [#allocation3], 1 }

</bundles_post_ra>
